<compile_context>
chip_gen: v7x
topology: tpu7x:2x2x1
jax: 0.10.0
libtpu: 0.0.40
codegen_flags: <defaults>
</compile_context>

<pallas_src>
import jax
import jax.numpy as jnp
from jax.experimental import pallas as pl
from jax.experimental.pallas import tpu as pltpu  # noqa: F401 (only needed at backbone scale)

KH, KW = 3, 3          # 3x3 conv, stride 1, padding 1 ("same")
K_PAD_MULT = 8         # pad the contraction dim to a sublane multiple


def _conv_relu_kernel(x_ref, w_ref, o_ref):
    """Single-step kernel: whole (toy-size) problem resident in VMEM.

    x_ref: [K_pad, N*HW]   im2col patches + ones-row (bias) + zero pad rows
    w_ref: [C_out, K_pad]  conv weights + bias column + zero pad columns
    o_ref: [C_out, N*HW]   channels-major output, lane index = n*HW + hw
    """
    acc = jnp.dot(w_ref[...], x_ref[...], preferred_element_type=jnp.float32)
    o_ref[...] = jnp.maximum(acc, 0.0).astype(o_ref.dtype)   # fused ReLU, 512-lane store


def _im2col_batch_in_lanes(x_nchw):
    """[N, C, H, W] -> [KH*KW*C, N*H*W] patches for a 3x3 / 'same' conv.

    Row  index = (kh*KW + kw)*C + c   (matches w_hwio.reshape(KH*KW*C, C_out)).
    Lane index = n*H*W + h*W + w      (batch folded into the lane dimension).
    """
    n, c, h, w = x_nchw.shape
    x_pad = jnp.pad(x_nchw, ((0, 0), (0, 0), (1, 1), (1, 1)))
    taps = [x_pad[:, :, kh:kh + h, kw:kw + w]
            for kh in range(KH) for kw in range(KW)]          # each [N, C, H, W]
    cols = jnp.stack(taps, axis=0)                            # [9, N, C, H, W]
    cols = cols.transpose(0, 2, 1, 3, 4)                      # [9, C, N, H, W]
    return cols.reshape(KH * KW * c, n * h * w)


@jax.jit
def encoder_forward(x_nchw, w_hwio, bias):
    """Conv2d(3x3, stride 1, pad 1) + ReLU, matching PyTorch NCHW semantics.

    x_nchw: [N, C_in, H, W] f32;  w_hwio: [KH, KW, C_in, C_out];  bias: [C_out]
    returns [N, C_out, H, W] f32
    """
    n, c_in, h, w = x_nchw.shape
    c_out = w_hwio.shape[-1]
    k = KH * KW * c_in
    nhw = n * h * w
    # +1 for the folded bias row, rounded up to a multiple of 8 sublanes (36 -> 40).
    k_pad = ((k + 1 + K_PAD_MULT - 1) // K_PAD_MULT) * K_PAD_MULT

    # Patches with bias folded in as a ones-row, zero-padded to k_pad sublanes.
    x_cols = _im2col_batch_in_lanes(x_nchw)                   # [K, N*HW]
    x_aug = jnp.concatenate(
        [x_cols,
         jnp.ones((1, nhw), x_cols.dtype),                    # bias row
         jnp.zeros((k_pad - k - 1, nhw), x_cols.dtype)],      # alignment pad
        axis=0)                                               # [K_pad, N*HW]

    # Weights [C_out, K_pad]: conv taps (same K ordering), bias column, zero pad.
    w2d = w_hwio.reshape(k, c_out).T                          # [C_out, K]
    w_aug = jnp.concatenate(
        [w2d,
         bias[:, None].astype(w2d.dtype),
         jnp.zeros((c_out, k_pad - k - 1), w2d.dtype)],
        axis=1)                                               # [C_out, K_pad]

    cost = pl.CostEstimate(
        flops=2 * c_out * k_pad * nhw,
        transcendentals=0,
        bytes_accessed=4 * (k_pad * nhw + c_out * k_pad + c_out * nhw))

    # Single invocation (no grid): whole arrays live in VMEM for one fused dot.
    out2d = pl.pallas_call(
        _conv_relu_kernel,
        out_shape=jax.ShapeDtypeStruct((c_out, nhw), jnp.float32),
        cost_estimate=cost,
    )(x_aug, w_aug)

    # [C_out, N*HW] -> [N, C_out, H, W]; tiny (16 KiB) wrapper-side transpose.
    return jnp.transpose(out2d.reshape(c_out, n, h, w), (1, 0, 2, 3))


def _reference(x_nchw, w_hwio, bias):
    y = jax.lax.conv_general_dilated(
        x_nchw, w_hwio, window_strides=(1, 1), padding="SAME",
        dimension_numbers=("NCHW", "HWIO", "NCHW"))
    return jnp.maximum(y + bias[None, :, None, None], 0.0)


if __name__ == "__main__":
    key = jax.random.PRNGKey(0)
    k_x, k_w, k_b = jax.random.split(key, 3)

    N, C_IN, H, W = 2, 4, 16, 16
    C_OUT = 8

    x = jax.random.normal(k_x, (N, C_IN, H, W), dtype=jnp.float32)
    # Deterministic Kaiming-like init for the synthesized conv weights.
    fan_in = KH * KW * C_IN
    w = jax.random.normal(k_w, (KH, KW, C_IN, C_OUT), dtype=jnp.float32) * (
        (2.0 / fan_in) ** 0.5)
    b = jax.random.normal(k_b, (C_OUT,), dtype=jnp.float32) * 0.01

    out = jax.block_until_ready(encoder_forward(x, w, b))
    ref = jax.block_until_ready(_reference(x, w, b))

    assert out.shape == (N, C_OUT, H, W)
    assert jnp.allclose(out, ref, atol=1e-4, rtol=1e-4), "mismatch vs reference"

    print("KERNEL_OK")
</pallas_src>

<mosaic_0001>
module attributes {stable_mosaic.version = 11 : i64} {
  func.func @_conv_relu_kernel(%arg0: memref<40x512xf32, #tpu.memory_space<vmem>>, %arg1: memref<8x40xf32, #tpu.memory_space<vmem>>, %arg2: memref<8x512xf32, #tpu.memory_space<vmem>>) attributes {dimension_semantics = [], scalar_prefetch = 0 : i64, scratch_operands = 0 : i64, tpu.core_type = #tpu.core_type<tc>} {
    %c0 = arith.constant 0 : index
    %c0_0 = arith.constant 0 : index
    %0 = vector.load %arg1[%c0, %c0_0] : memref<8x40xf32, #tpu.memory_space<vmem>>, vector<8x40xf32>
    %c0_1 = arith.constant 0 : index
    %c0_2 = arith.constant 0 : index
    %1 = vector.load %arg0[%c0_1, %c0_2] : memref<40x512xf32, #tpu.memory_space<vmem>>, vector<40x512xf32>
    %cst = arith.constant dense<0.000000e+00> : vector<8x512xf32>
    %2 = tpu.matmul %0, %1, %cst {dimension_numbers = #tpu.dot_dimension_numbers<[1], [0], [0], [1], [0, 0, 1, 1], [], []>} : vector<8x40xf32>, vector<40x512xf32>, vector<8x512xf32> -> vector<8x512xf32>
    %cst_3 = arith.constant 0.000000e+00 : f32
    %3 = vector.broadcast %cst_3 : f32 to vector<8x512xf32>
    %4 = arith.maximumf %2, %3 : vector<8x512xf32>
    %c0_4 = arith.constant 0 : index
    %c0_5 = arith.constant 0 : index
    %5 = vector.load %arg2[%c0_4, %c0_5] : memref<8x512xf32, #tpu.memory_space<vmem>>, vector<8x512xf32>
    tpu.vector_store %arg2[%c0_4, %c0_5], %4 {strides = array<i32>} : memref<8x512xf32, #tpu.memory_space<vmem>>, vector<8x512xf32>,
    return
  }
}

</mosaic_0001>

<bundles_post_ra>
// kernel: encoder_forward.1
= control target key start
LH: loop header
LB: loop body
LE: loop exit
PB: predicated region body
PF: predicated region fallthrough
CT: control target
= control target key end

     0   :  { %v209_v3 = vmov 0.0   ;;  %vm32_vm0 = vcmask 326656   ;;  %s300_s0 = inlined_call_operand.vmem [shape: f32[40,512], index: 0, kind: input, shape index: {}]   ;;  %s301_s1 = inlined_call_operand.vmem [shape: f32[8,40], index: 1, kind: input, shape index: {}]   ;;  %s302_s2 = inlined_call_operand.vmem [shape: f32[8,512], index: 2, kind: output, shape index: {}]  }
   0x1   :  { %v13_v0 = vld [vmem:[%s300_s0 + $0x8] sm:$0xff]  ;;  %v15_v2 = vld [vmem:[%s300_s0 + $0x18] sm:$0xff]  ;;  %100 = vmatprep.mubr.f32.mxu0 %v209_v3  ;;  %171 = vmatprep.mubr.f32.mxu1 %v209_v3  ;;  %v12_v6 = vld [vmem:[%s300_s0] sm:$0xff] }
   0x2   :  { %v17_v1 = vld [vmem:[%s300_s0 + $0x28] sm:$0xff]  ;;  %v19_v5 = vld [vmem:[%s300_s0 + $0x38] sm:$0xff]  ;;  %v16_v7 = vld [vmem:[%s300_s0 + $0x20] sm:$0xff] }
   0x3   :  { %v192_v4 = vpack.c.bf16 %v17_v1, %v13_v0  ;;  %v200_v8 = vpack.c.bf16 %v19_v5, %v15_v2  ;;  %v194_v9 = vpack.c.bf16 %v16_v7, %v12_v6  ;;  %v14_v10 = vld [vmem:[%s300_s0 + $0x10] sm:$0xff]  ;;  %v21_v12 = vld [vmem:[%s300_s0 + $0x48] sm:$0xff]  ;;  %v23_v15 = vld [vmem:[%s300_s0 + $0x58] sm:$0xff] }
   0x4   :  { %v18_v11 = vld [vmem:[%s300_s0 + $0x30] sm:$0xff]  ;;  %v25_v14 = vld [vmem:[%s300_s0 + $0x68] sm:$0xff]  ;;  %v27_v16 = vld [vmem:[%s300_s0 + $0x78] sm:$0xff] }
   0x5   :  { %193 = vmatprep.subr.bf16.mxu0 %v192_v4  ;;  %v202_v13 = vpack.c.bf16 %v18_v11, %v14_v10  ;;  %201 = vmatprep.subr.bf16.mxu1 %v200_v8  ;;  %v196_v17 = vpack.c.bf16 %v25_v14, %v21_v12  ;;  %v204_v18 = vpack.c.bf16 %v27_v16, %v23_v15  ;;  %v20_v19 = vld [vmem:[%s300_s0 + $0x40] sm:$0xff]  ;;  %v22_v21 = vld [vmem:[%s300_s0 + $0x50] sm:$0xff]  ;;  %v29_v25 = vld [vmem:[%s300_s0 + $0x88] sm:$0xff] }
   0x6   :  { %195 = vmatpush1.bf16.msra.mxu0 %v194_v9  ;;  %v24_v20 = vld [vmem:[%s300_s0 + $0x60] sm:$0xff]  ;;  %v26_v23 = vld [vmem:[%s300_s0 + $0x70] sm:$0xff]  ;;  %v31_v26 = vld [vmem:[%s300_s0 + $0x98] sm:$0xff] }
   0x7   :  { %203 = vmatpush1.bf16.msra.mxu1 %v202_v13  ;;  %v198_v22 = vpack.c.bf16 %v24_v20, %v20_v19  ;;  %197 = vmatprep.subr.bf16.mxu0 %v196_v17  ;;  %v206_v24 = vpack.c.bf16 %v26_v23, %v22_v21  ;;  %v28_v27 = vld [vmem:[%s300_s0 + $0x80] sm:$0xff]  ;;  %v30_v28 = vld [vmem:[%s300_s0 + $0x90] sm:$0xff] }
   0x8   :  { %205 = vmatprep.subr.bf16.mxu1 %v204_v18  ;;  %v11_v29 = vld [vmem:[%s301_s1] sm:$0xff] }
   0xa   :  { %199 = vmatpush1.bf16.msra.mxu0 %v198_v22 }
   0xb   :  { %207 = vmatpush1.bf16.msra.mxu1 %v206_v24  ;;  %44 = vmatprep.subr.mxu0 %v29_v25 }
   0xc   :  { %115 = vmatprep.subr.mxu1 %v31_v26 }
   0xe   :  { %45 = vmatpush1.msra.mxu0 %v28_v27 }
   0xf   :  { %116 = vmatpush1.msra.mxu1 %v30_v28  ;;  %190 = vmatmul.mubr.msk.f32.vlgmr.msra.gmra.mrb[0].mxu0 %vm32_vm0, %v11_v29 }
  0x10   :  { %191 = vmatmul.mubr.msk.f32.vlgmr.msra.gmra.mrb[0].mxu1 %vm32_vm0, %v11_v29 }
  0xe2   :  { %v102_v30 = vpop.f32.mrb[0].mxu0 }
  0xe3   :  { %v178_v31 = vmax.f32 %v102_v30, 0.0  ;;  %v173_v32 = vpop.f32.mrb[0].mxu1  ;;  %v104_v33 = vpop.f32.mrb[1].mxu0 }
  0xe4   :  { %v180_v34 = vmax.f32 %v173_v32, 0.0  ;;  %v179_v35 = vmax.f32 %v104_v33, 0.0  ;;  %v175_v36 = vpop.f32.mrb[1].mxu1 }
  0xe5   :  { %182 = vst [vmem:[%s302_s2] sm:$0xff] %v178_v31  ;;  %v181_v37 = vmax.f32 %v175_v36, 0.0 }
  0xe6   :  { %184 = vst [vmem:[%s302_s2 + $0x10] sm:$0xff] %v180_v34  ;;  %183 = vst [vmem:[%s302_s2 + $0x8] sm:$0xff] %v179_v35 }
  0xe7   :  { %185 = vst [vmem:[%s302_s2 + $0x18] sm:$0xff] %v181_v37 }

</bundles_post_ra>
